<compile_context>
chip_gen: v5e
topology: v5e:2x2
jax: 0.10.0
libtpu: 0.0.40
codegen_flags: <defaults>
</compile_context>

<pallas_src>
import jax
import jax.numpy as jnp
from jax import lax
from jax.experimental import pallas as pl
from jax.experimental.pallas import tpu as pltpu

NEURONS = 48
D_ATTN = 8
INV_SQRT_D = 1.0 / (D_ATTN ** 0.5)

# Contract over dim 0 of both operands (q^T @ k without a materialized transpose).
_TN_DIMS = (((0,), (0,)), ((), ()))


def _vmem_budget_bytes():
    """Per-generation VMEM ceiling for the single-call path (~70% of physical)."""
    try:
        info = pltpu.get_tpu_info()
        cap = getattr(info, "vmem_capacity_bytes", None)
        if cap:
            return int(cap * 0.7)
    except Exception:
        pass
    return 44 << 20  # conservative (fits v7x's 64 MiB physical VMEM)


# ---------------------------------------------------------------------------
# Single-call fused kernel: the default path (whole batch resident in VMEM).
# ---------------------------------------------------------------------------
def ultimus_fused_kernel(x_ref, wkqv_ref, bkqv_ref, wo_ref, bo_ref, o_ref):
    x = x_ref[...]                                                     # (B, 48)

    # One fused projection for k|q|v (single MXU push instead of three).
    kqv = jnp.dot(x, wkqv_ref[...],
                  preferred_element_type=jnp.float32) + bkqv_ref[...]  # (B, 24)
    k = kqv[:, 0:D_ATTN]
    q = kqv[:, D_ATTN:2 * D_ATTN]
    v = kqv[:, 2 * D_ATTN:3 * D_ATTN]

    # mul = q^T @ k -> (8, 8): contraction over the batch axis, no transpose.
    mul = lax.dot_general(q, k, _TN_DIMS, preferred_element_type=jnp.float32)

    # softmax over dim=1, scaled by 1/sqrt(8); exact divide (only 8x8 values).
    m = jnp.max(mul, axis=1, keepdims=True)
    e = jnp.exp(mul - m)
    denom = jnp.sum(e, axis=1, keepdims=True)
    am = (e / denom) * INV_SQRT_D                                      # (8, 8)

    # Fold am into the output projection: out = v @ (am @ Wo) + bo.
    w_eff = jnp.dot(am, wo_ref[...], preferred_element_type=jnp.float32)  # (8, 48)
    out = jnp.dot(v, w_eff, preferred_element_type=jnp.float32) + bo_ref[...]
    o_ref[...] = out.astype(o_ref.dtype)


# ---------------------------------------------------------------------------
# Tiled path (only when B exceeds the single-call VMEM budget).
# ---------------------------------------------------------------------------
def _phase1_kernel(x_ref, wkqv_ref, bkqv_ref, mulp_ref, v_ref):
    """Single pass over x: emit v tile, accumulate per-core 8x8 q^T.k partial."""
    i = pl.program_id(1)

    kqv = jnp.dot(x_ref[...], wkqv_ref[...],
                  preferred_element_type=jnp.float32) + bkqv_ref[...]  # (TB, 24)
    k = kqv[:, 0:D_ATTN]
    q = kqv[:, D_ATTN:2 * D_ATTN]
    v_ref[...] = kqv[:, 2 * D_ATTN:3 * D_ATTN]

    @pl.when(i == 0)
    def _init():
        mulp_ref[...] = jnp.zeros_like(mulp_ref)

    # Accumulate directly in the resident (1, 8, 8) output block.
    mulp_ref[...] += lax.dot_general(
        q, k, _TN_DIMS, preferred_element_type=jnp.float32)[None]


def _phase2_kernel(v_ref, weff_ref, bo_ref, o_ref):
    out = jnp.dot(v_ref[...], weff_ref[...],
                  preferred_element_type=jnp.float32) + bo_ref[...]    # (TB, 48)
    o_ref[...] = out.astype(o_ref.dtype)


def _ultimus_tiled(x, w_kqv, b_kqv, wo, bo, batch_tile):
    B = x.shape[0]
    assert B % batch_tile == 0, "B must be divisible by batch_tile"
    n_tiles = B // batch_tile
    # Leading parallel axis: lets v7x's two TensorCores each own a partial sum.
    n_split = 2 if n_tiles % 2 == 0 else 1
    n_inner = n_tiles // n_split

    mul_partial, v = pl.pallas_call(
        _phase1_kernel,
        out_shape=(
            jax.ShapeDtypeStruct((n_split, D_ATTN, D_ATTN), jnp.float32),
            jax.ShapeDtypeStruct((B, D_ATTN), jnp.float32),
        ),
        grid_spec=pltpu.PrefetchScalarGridSpec(
            num_scalar_prefetch=0,
            grid=(n_split, n_inner),
            in_specs=[
                pl.BlockSpec((batch_tile, NEURONS),
                             lambda c, i: (c * n_inner + i, 0)),
                pl.BlockSpec((NEURONS, 3 * D_ATTN), lambda c, i: (0, 0)),
                pl.BlockSpec((1, 3 * D_ATTN), lambda c, i: (0, 0)),
            ],
            out_specs=(
                pl.BlockSpec((1, D_ATTN, D_ATTN), lambda c, i: (c, 0, 0)),
                pl.BlockSpec((batch_tile, D_ATTN),
                             lambda c, i: (c * n_inner + i, 0)),
            ),
        ),
        compiler_params=pltpu.CompilerParams(
            dimension_semantics=("parallel", "arbitrary")),
    )(x, w_kqv, b_kqv)

    # Tiny (8,8)-sized work: combine per-core partials, softmax, fold into Wo.
    mul = jnp.sum(mul_partial, axis=0)                       # (8, 8)
    am = jax.nn.softmax(mul, axis=1) * INV_SQRT_D            # (8, 8)
    w_eff = am @ wo                                          # (8, 48)

    out = pl.pallas_call(
        _phase2_kernel,
        out_shape=jax.ShapeDtypeStruct((B, NEURONS), jnp.float32),
        grid_spec=pltpu.PrefetchScalarGridSpec(
            num_scalar_prefetch=0,
            grid=(n_tiles,),
            in_specs=[
                pl.BlockSpec((batch_tile, D_ATTN), lambda i: (i, 0)),
                pl.BlockSpec((D_ATTN, NEURONS), lambda i: (0, 0)),
                pl.BlockSpec((1, NEURONS), lambda i: (0, 0)),
            ],
            out_specs=pl.BlockSpec((batch_tile, NEURONS), lambda i: (i, 0)),
        ),
        compiler_params=pltpu.CompilerParams(
            dimension_semantics=("parallel",)),
    )(v, w_eff, bo)
    return out


# ---------------------------------------------------------------------------
# Wrapper / dispatch
# ---------------------------------------------------------------------------
def ultimus_forward(x, params, *, batch_tile=None):
    """params = (w_kqv (48,24), b_kqv (1,24), wo (8,48), bo (1,48)).

    Default: the single fused ungridded kernel whenever the whole batch fits
    the per-generation VMEM budget (tens of thousands of rows on every chip);
    otherwise a two-phase batch-tiled pipeline with a large batch_tile.
    """
    w_kqv, b_kqv, wo, bo = params
    B = x.shape[0]

    budget = _vmem_budget_bytes()
    # Rough per-row footprint of the single call: x + out + kqv + slices (f32).
    per_row_bytes = (NEURONS + NEURONS + 3 * D_ATTN + 2 * D_ATTN) * 4  # ~512 B

    if batch_tile is None:
        if B * per_row_bytes <= budget:
            batch_tile = B
        else:
            for cand in (8192, 4096, 2048, 1024, 512, 256, 128):
                if B % cand == 0:
                    batch_tile = cand
                    break
            else:
                batch_tile = B   # no clean divisor; fall back to single call

    if batch_tile >= B:
        vmem = pl.BlockSpec(memory_space=pltpu.MemorySpace.VMEM)
        return pl.pallas_call(
            ultimus_fused_kernel,
            out_shape=jax.ShapeDtypeStruct((B, NEURONS), jnp.float32),
            in_specs=[vmem] * 5,
            out_specs=vmem,
            compiler_params=pltpu.CompilerParams(vmem_limit_bytes=budget),
        )(x, w_kqv, b_kqv, wo, bo)

    return _ultimus_tiled(x, w_kqv, b_kqv, wo, bo, batch_tile)


# ---------------------------------------------------------------------------
# Params & reference
# ---------------------------------------------------------------------------
def init_params(key):
    """PyTorch-style uniform(-1/sqrt(fan_in), 1/sqrt(fan_in)) init.

    Weights stored as (in_features, out_features); k|q|v fused along out dim."""
    ks = jax.random.split(key, 8)

    def lin(kw, kb, fan_in, fan_out):
        bound = 1.0 / jnp.sqrt(jnp.float32(fan_in))
        w = jax.random.uniform(kw, (fan_in, fan_out), jnp.float32, -bound, bound)
        b = jax.random.uniform(kb, (1, fan_out), jnp.float32, -bound, bound)
        return w, b

    wk, bk = lin(ks[0], ks[1], NEURONS, D_ATTN)
    wq, bq = lin(ks[2], ks[3], NEURONS, D_ATTN)
    wv, bv = lin(ks[4], ks[5], NEURONS, D_ATTN)
    wo, bo = lin(ks[6], ks[7], D_ATTN, NEURONS)

    w_kqv = jnp.concatenate([wk, wq, wv], axis=1)   # (48, 24)
    b_kqv = jnp.concatenate([bk, bq, bv], axis=1)   # (1, 24)
    return (w_kqv, b_kqv, wo, bo)


def ultimus_ref(x, params):
    """Pure-JAX reference for sanity checking (matches the PyTorch module)."""
    w_kqv, b_kqv, wo, bo = params
    k = x @ w_kqv[:, :D_ATTN] + b_kqv[:, :D_ATTN]
    q = x @ w_kqv[:, D_ATTN:2 * D_ATTN] + b_kqv[:, D_ATTN:2 * D_ATTN]
    v = x @ w_kqv[:, 2 * D_ATTN:] + b_kqv[:, 2 * D_ATTN:]
    mul = q.T @ k
    am = jax.nn.softmax(mul, axis=1) / jnp.sqrt(jnp.float32(D_ATTN))
    z = v @ am
    return z @ wo + bo


if __name__ == "__main__":
    key = jax.random.PRNGKey(0)
    k_x, k_p = jax.random.split(key)
    params = init_params(k_p)

    # Matmul precision (bf16 passes in the XLA reference) dominates the error.
    ATOL = RTOL = 5e-3

    # Small batch: single fused ungridded kernel (the default dispatch).
    B = 16
    x = jax.random.normal(k_x, (B, NEURONS), jnp.float32)
    out = jax.block_until_ready(ultimus_forward(x, params))
    ref = ultimus_ref(x, params)
    assert out.shape == (B, NEURONS)
    assert jnp.allclose(out, ref, atol=ATOL, rtol=RTOL), "small-B mismatch"

    # Exercise the two-phase tiled path explicitly (forced via batch_tile).
    B_big = 1024
    x_big = jax.random.normal(jax.random.PRNGKey(1), (B_big, NEURONS), jnp.float32)
    out_big = jax.block_until_ready(
        ultimus_forward(x_big, params, batch_tile=256))
    ref_big = ultimus_ref(x_big, params)
    assert jnp.allclose(out_big, ref_big, atol=ATOL, rtol=RTOL), "tiled mismatch"

    # Same batch through the default dispatch (single fused call) as well.
    out_big_fused = jax.block_until_ready(ultimus_forward(x_big, params))
    assert jnp.allclose(out_big_fused, ref_big, atol=ATOL, rtol=RTOL), \
        "fused large-B mismatch"

    print("KERNEL_OK")
</pallas_src>

<mosaic_0001>
module attributes {stable_mosaic.version = 11 : i64} {
  func.func @ultimus_fused_kernel(%arg0: memref<16x48xf32, #tpu.memory_space<vmem>>, %arg1: memref<48x24xf32, #tpu.memory_space<vmem>>, %arg2: memref<1x24xf32, #tpu.memory_space<vmem>>, %arg3: memref<8x48xf32, #tpu.memory_space<vmem>>, %arg4: memref<1x48xf32, #tpu.memory_space<vmem>>, %arg5: memref<16x48xf32, #tpu.memory_space<vmem>>) attributes {dimension_semantics = [], scalar_prefetch = 0 : i64, scratch_operands = 0 : i64, tpu.core_type = #tpu.core_type<tc>} {
    %c0 = arith.constant 0 : index
    %c0_0 = arith.constant 0 : index
    %0 = vector.load %arg0[%c0, %c0_0] : memref<16x48xf32, #tpu.memory_space<vmem>>, vector<16x48xf32>
    %c0_1 = arith.constant 0 : index
    %c0_2 = arith.constant 0 : index
    %1 = vector.load %arg1[%c0_1, %c0_2] : memref<48x24xf32, #tpu.memory_space<vmem>>, vector<48x24xf32>
    %cst = arith.constant dense<0.000000e+00> : vector<16x24xf32>
    %2 = tpu.matmul %0, %1, %cst {dimension_numbers = #tpu.dot_dimension_numbers<[1], [0], [0], [1], [0, 0, 1, 1], [], []>} : vector<16x48xf32>, vector<48x24xf32>, vector<16x24xf32> -> vector<16x24xf32>
    %c0_3 = arith.constant 0 : index
    %c0_4 = arith.constant 0 : index
    %3 = vector.load %arg2[%c0_3, %c0_4] : memref<1x24xf32, #tpu.memory_space<vmem>>, vector<1x24xf32>
    %4 = vector.broadcast %3 : vector<1x24xf32> to vector<16x24xf32>
    %5 = arith.addf %2, %4 : vector<16x24xf32>
    %6 = vector.extract_strided_slice %5 {offsets = [0, 0], sizes = [16, 8], strides = [1, 1]} : vector<16x24xf32> to vector<16x8xf32>
    %7 = vector.extract_strided_slice %5 {offsets = [0, 8], sizes = [16, 8], strides = [1, 1]} : vector<16x24xf32> to vector<16x8xf32>
    %8 = vector.extract_strided_slice %5 {offsets = [0, 16], sizes = [16, 8], strides = [1, 1]} : vector<16x24xf32> to vector<16x8xf32>
    %cst_5 = arith.constant dense<0.000000e+00> : vector<8x8xf32>
    %9 = tpu.matmul %7, %6, %cst_5 {dimension_numbers = #tpu.dot_dimension_numbers<[0], [0], [1], [1], [0, 1, 1, 1], [], []>} : vector<16x8xf32>, vector<16x8xf32>, vector<8x8xf32> -> vector<8x8xf32>
    %cst_6 = arith.constant dense<0xFF800000> : vector<8xf32>
    %10 = vector.multi_reduction <maximumf>, %9, %cst_6 [1] : vector<8x8xf32> to vector<8xf32>
    %11 = vector.shape_cast %10 : vector<8xf32> to vector<8x1xf32>
    %12 = vector.broadcast %11 : vector<8x1xf32> to vector<8x8xf32>
    %13 = arith.subf %9, %12 : vector<8x8xf32>
    %14 = math.exp %13 : vector<8x8xf32>
    %cst_7 = arith.constant dense<0.000000e+00> : vector<8xf32>
    %15 = vector.multi_reduction <add>, %14, %cst_7 [1] : vector<8x8xf32> to vector<8xf32>
    %16 = vector.shape_cast %15 : vector<8xf32> to vector<8x1xf32>
    %17 = vector.broadcast %16 : vector<8x1xf32> to vector<8x8xf32>
    %18 = arith.divf %14, %17 : vector<8x8xf32>
    %cst_8 = arith.constant 0.353553385 : f32
    %19 = vector.broadcast %cst_8 : f32 to vector<8x8xf32>
    %20 = arith.mulf %18, %19 : vector<8x8xf32>
    %c0_9 = arith.constant 0 : index
    %c0_10 = arith.constant 0 : index
    %21 = vector.load %arg3[%c0_9, %c0_10] : memref<8x48xf32, #tpu.memory_space<vmem>>, vector<8x48xf32>
    %cst_11 = arith.constant dense<0.000000e+00> : vector<8x48xf32>
    %22 = tpu.matmul %20, %21, %cst_11 {dimension_numbers = #tpu.dot_dimension_numbers<[1], [0], [0], [1], [0, 0, 1, 1], [], []>} : vector<8x8xf32>, vector<8x48xf32>, vector<8x48xf32> -> vector<8x48xf32>
    %cst_12 = arith.constant dense<0.000000e+00> : vector<16x48xf32>
    %23 = tpu.matmul %8, %22, %cst_12 {dimension_numbers = #tpu.dot_dimension_numbers<[1], [0], [0], [1], [0, 0, 1, 1], [], []>} : vector<16x8xf32>, vector<8x48xf32>, vector<16x48xf32> -> vector<16x48xf32>
    %c0_13 = arith.constant 0 : index
    %c0_14 = arith.constant 0 : index
    %24 = vector.load %arg4[%c0_13, %c0_14] : memref<1x48xf32, #tpu.memory_space<vmem>>, vector<1x48xf32>
    %25 = vector.broadcast %24 : vector<1x48xf32> to vector<16x48xf32>
    %26 = arith.addf %23, %25 : vector<16x48xf32>
    %c0_15 = arith.constant 0 : index
    %c0_16 = arith.constant 0 : index
    %27 = vector.load %arg5[%c0_15, %c0_16] : memref<16x48xf32, #tpu.memory_space<vmem>>, vector<16x48xf32>
    tpu.vector_store %arg5[%c0_15, %c0_16], %26 {strides = array<i32>} : memref<16x48xf32, #tpu.memory_space<vmem>>, vector<16x48xf32>,
    return
  }
}

</mosaic_0001>

<bundles_post_ra>
// kernel: tpu_custom_call.1
= control target key start
LH: loop header
LB: loop body
LE: loop exit
PB: predicated region body
PF: predicated region fallthrough
CT: control target
= control target key end

     0   :  { %s356_s0 = inlined_call_operand.vmem [shape: f32[16,48], index: 0, kind: input, shape index: {}]   ;;  %s357_s1 = inlined_call_operand.vmem [shape: f32[48,24], index: 1, kind: input, shape index: {}]   ;;  %s358_s2 = inlined_call_operand.vmem [shape: f32[1,24], index: 2, kind: input, shape index: {}]   ;;  %s359_s3 = inlined_call_operand.vmem [shape: f32[8,48], index: 3, kind: input, shape index: {}]   ;;  %s360_s4 = inlined_call_operand.vmem [shape: f32[1,48], index: 4, kind: input, shape index: {}]   ;;  %s361_s5 = inlined_call_operand.hbm [shape: f32[16,48], index: 5, kind: output, shape index: {}]  }
   0x1   :  { %v28_v0 = vld [vmem:[%s357_s1 + $0x28] sm:$0xff]  ;;  %v27_v1 = vld [vmem:[%s357_s1 + $0x20] sm:$0xff]  ;;  %v26_v2 = vld [vmem:[%s357_s1 + $0x18] sm:$0xff] }
   0x2   :  { %50 = vmatpush.msra.mxu0 %v28_v0 }
   0x4   :  { %51 = vmatpush.msra.mxu0 %v27_v1 }
   0x5   :  { %10 = vsyncpa [#allocation3], 0  ;;  %v25_v3 = vld [vmem:[%s357_s1 + $0x10] sm:$0xff]  ;;  %v24_v4 = vld [vmem:[%s357_s1 + $0x8] sm:$0xff]  ;;  %vm33_vm0 = vcmask 392192   ;;  %s277_s11 = smov 112  }
   0x6   :  { %52 = vmatpush.msra.mxu0 %v26_v2  ;;  %v23_v5 = vld [vmem:[%s357_s1] sm:$0xff]  ;;  %v22_v7 = vld [vmem:[%s356_s0 + $0x8] sm:$0xff]  ;;  %s276_s1 = smov 120   ;;  %vm103_vm1 = vcmask 130048   ;;  %vm127_vm2 = vcmask 64512   ;;  %s278_s13 = smov [#allocation2]  }
   0x7   :  { %v21_v6 = vld [vmem:[%s356_s0] sm:$0xff]  ;;  %s218_s14 = sshll.u32 %s278_s13, 4  ;;  %s220_s17 = sshll.u32 %s361_s5, 4  ;;  %s219_s14 = int_to_ptr.vmem [resolvable:$true] %s218_s14  ;;  %s221_s17 = int_to_ptr.hbm [resolvable:$true] %s220_s17 }
   0x8   :  { %53 = vmatpush.msra.mxu0 %v25_v3  ;;  %v244_v8 = vld [vmem:[%s358_s2] ss:$0 sm:$0xff]  ;;  %s279_s18 = smov 128   ;;  %s280_s19 = smov 8  }
   0x9   :  { %v153_v23 = vld [vmem:[%s359_s3] sm:$0xff] }
   0xa   :  { %54 = vmatpush.msra.mxu0 %v24_v4  ;;  %172 = vmatpush.msra.mxu2 %v153_v23  ;;  %v245_v40 = vld [vmem:[%s360_s4] ss:$0 sm:$0xff] }
   0xc   :  { %55 = vmatpush.msra.mxu0 %v23_v5 }
   0xd   :  { %232 = vmatmul.msk.f32.vlgmr.msra.gmra.mxu0 %vm33_vm0, %v21_v6 }
  0x15   :  { %233 = vmatmul.msk.f32.gmra.mxu0 %vm33_vm0, %v22_v7 }
  0x8a   :  { %v57_v9 = vpop.f32.mrf.mxu0 }
  0x8b   :  { %v58_v10 = vadd.f32 %v244_v8, %v57_v9 }
  0x8d   :  { %65 = vrot.lane.b32.xlu0 %v58_v10, %s276_s1 }
  0x92   :  { %v60_v11 = vpop.f32.mrf.mxu0 }
  0x93   :  { %v61_v12 = vadd.f32 %v244_v8, %v60_v11 }
  0x95   :  { %121 = vmatpush.msra.mxu1 %v61_v12  ;;  %67 = vrot.lane.b32.xlu0 %v61_v12, %s276_s1 }
  0x97   :  { %122 = vmatpush.msra.mxu1 %v58_v10 }
  0x9d   :  { %181 = vrot.lane.b32.xlu0 %v58_v10, %s277_s11 }
  0xff   :  { %v66_v13 = vpop.permute.xlu0 %65 }
 0x100   :  { %71 = vxpose.xlu1.b32.start [1/2] (short) (narrow) %v66_v13, 8 }
 0x107   :  { %v68_v14 = vpop.permute.xlu0 %67 }
 0x108   :  { %72 = vxpose.xlu1.b32.end [2/2] (short) (narrow) %v68_v14, 8 }
 0x10f   :  { %v182_v38 = vpop.permute.xlu0 %181 }
 0x162   :  { %183 = vrot.lane.b32.xlu1 %v61_v12, %s277_s11 }
 0x1a4   :  { %v87_v15 = vpop.trf.xlu1 }
 0x1a5   :  { %234 = vmatmul.msk.f32.vlgmr.msra.gmra.mxu1 %vm103_vm1, %v87_v15 }
 0x1d4   :  { %v184_v39 = vpop.permute.xlu1 %183 }
 0x222   :  { %v124_v16 = vpop.f32.mrf.mxu1 }
 0x223   :  { %v128_v17 = vsel %vm127_vm2, %v124_v16, -inf }
 0x224   :  { %129 = vmax.xlane.f32.xlu2 %v128_v17 }
 0x297   :  { %v130_v18 = vpop.xlane.xlu2 %129 }
 0x298   :  { %v131_v19 = vsub.f32 %v124_v16, %v130_v18 }
 0x29a   :  { %v132_v20 = vmul.f32 1.442695, %v131_v19 }
 0x29c   :  { %246 = vpow2.f32 %v132_v20 }
 0x2a2   :  { %v247_v21 = vpop.eup %246 }
 0x2a3   :  { %v134_v22 = vsel %vm127_vm2, %v247_v21, 0.0 }
 0x2a4   :  { %135 = vadd.xlane.f32.xlu2 %v134_v22 }
 0x317   :  { %v136_v24 = vpop.xlane.xlu2 %135 }
 0x318   :  { %248 = vrcp.f32 %v136_v24  ;;  %v148_v28 = vand.u32 2147483648, %v136_v24  ;;  %v146_v30 = vand.u32 2147483647, %v136_v24  ;;  %vm142_vm4 = vweird.f32 %v136_v24 }
 0x31a   :  { %v149_v32 = vor.u32 1.1754944e-38, %v148_v28  ;;  %vm147_vm6 = vcmp.eq.f32.partialorder %v146_v30, 8.507059e+37 }
 0x31e   :  { %v249_v25 = vpop.eup %248 }
 0x31f   :  { %v138_v26 = vmul.f32 %v249_v25, %v136_v24  ;;  %vm143_vm3 = vweird.f32 %v249_v25 }
 0x320   :  { %vm144_vm5 = vmor %vm142_vm4, %vm143_vm3 }
 0x321   :  { %v139_v27 = vsub.f32 1.0, %v138_v26 }
 0x323   :  { %v140_v29 = vmul.f32 %v249_v25, %v139_v27 }
 0x325   :  { %v141_v31 = vadd.f32 %v249_v25, %v140_v29 }
 0x327   :  { %v145_v33 = vsel %vm144_vm5, %v249_v25, %v141_v31 }
 0x328   :  { %v150_v34 = vsel %vm147_vm6, %v149_v32, %v145_v33 }
 0x329   :  { %v151_v35 = vmul.f32 %v247_v21, %v150_v34 }
 0x32b   :  { %v152_v36 = vmul.f32 0.35355338, %v151_v35 }
 0x32d   :  { %235 = vmatmul.msk.f32.vlgmr.msra.gmra.mxu2 %vm127_vm2, %v152_v36 }
 0x3b0   :  { %v174_v37 = vpop.f32.mrf.mxu2 }
 0x3b1   :  { %204 = vmatpush.msra.mxu3 %v174_v37 }
 0x3b2   :  { %236 = vmatmul.msk.f32.vlgmr.msra.gmra.mxu3 %vm127_vm2, %v182_v38 }
 0x3ba   :  { %237 = vmatmul.msk.f32.gmra.mxu3 %vm127_vm2, %v184_v39 }
 0x435   :  { %v206_v41 = vpop.f32.mrf.mxu3 }
 0x436   :  { %v207_v42 = vadd.f32 %v245_v40, %v206_v41 }
 0x438   :  { %212 = vst.msk [vmem:[#allocation2] sm:$0xff] %vm33_vm0, %v207_v42 }
 0x43d   :  { %v209_v43 = vpop.f32.mrf.mxu3 }
 0x43e   :  { %v210_v44 = vadd.f32 %v245_v40, %v209_v43 }
 0x440   :  { %213 = vst.msk [vmem:[#allocation2 + $0x8] sm:$0xff] %vm33_vm0, %v210_v44 }
 0x441   :  { %226 = dma.vmem_to_hbm [thread:$0]  %s219_s14, 256, %s221_s17, [#allocation3], %s279_s18, %s279_s18, %s280_s19  }
 0x442   :  { %274 = dma.done.wait [#allocation3], 256  }
 0x443   :  { %275 = vsyncadd [#allocation3], 4294967040 }
 0x444   :  { %231 = vsyncpa [#allocation3], 1 }

</bundles_post_ra>
